<compile_context>
chip_gen: v5e
topology: v5e:2x2
jax: 0.10.0
libtpu: 0.0.40
codegen_flags: <defaults>
</compile_context>

<pallas_src>
import jax
import jax.numpy as jnp
from jax.experimental import pallas as pl
from jax.experimental.pallas import tpu as pltpu


def _round_up(x, m):
    return (x + m - 1) // m * m


def actor_kernel(theta_ref, a_ref, o_ref):
    # theta_ref: SMEM (1,) scalar; a_ref / o_ref: VMEM [TM, Np] tiles.
    t = theta_ref[0]
    # Numerically stable p0 = sigmoid(-theta) = 1 / (1 + exp(theta)).
    e_neg = jnp.exp(-jnp.abs(t))
    p0 = jnp.where(t >= 0, e_neg / (1.0 + e_neg), 1.0 / (1.0 + e_neg))
    # policies = actions * p1 + (1 - actions) * p0  ==  p0 - actions  (since p1 = p0 - 1)
    o_ref[...] = p0 - a_ref[...]


def actor_forward(theta, actions, *, target_block_bytes=2 * 1024 * 1024):
    """theta: (1,) float32, actions: (B, N) float32 -> (B, N) float32."""
    theta = jnp.asarray(theta, jnp.float32)
    actions = jnp.asarray(actions, jnp.float32)
    B, N = actions.shape

    # Lane/sublane-aligned padded shape: rows -> multiple of 8, lanes -> multiple of 128.
    B_pad = _round_up(B, 8)
    N_pad = _round_up(N, 128)
    if (B_pad, N_pad) != (B, N):
        a = jnp.zeros((B_pad, N_pad), jnp.float32).at[:B, :N].set(actions)
    else:
        a = actions

    # Row-tile size targeting ~2 MiB per block (safe under v7x's 64 MiB VMEM with
    # double-buffered in + out, and big enough to reach HBM roofline on v5e/v6e).
    rows_per_block = max(8, (target_block_bytes // (N_pad * 4)) // 8 * 8)
    TM = min(B_pad, rows_per_block)
    grid = (pl.cdiv(B_pad, TM),)

    out = pl.pallas_call(
        actor_kernel,
        out_shape=jax.ShapeDtypeStruct((B_pad, N_pad), jnp.float32),
        grid=grid,
        in_specs=[
            pl.BlockSpec(memory_space=pltpu.MemorySpace.SMEM),  # theta scalar
            pl.BlockSpec((TM, N_pad), lambda i: (i, 0)),        # actions tile
        ],
        out_specs=pl.BlockSpec((TM, N_pad), lambda i: (i, 0)),
        compiler_params=pltpu.CompilerParams(
            dimension_semantics=("parallel",),  # megacore sharding on v7x; no-op on v5e/v6e
        ),
    )(theta, a)

    return out[:B, :N]


def _reference(theta, actions):
    # Naive PyTorch-equivalent formula.
    e = jnp.exp(theta[0])
    p0 = 1.0 / (1.0 + e)
    p1 = -e / (1.0 + e)
    return actions * p1 + (1.0 - actions) * p0


if __name__ == "__main__":
    key = jax.random.PRNGKey(0)
    k_theta, k_act1, k_act2 = jax.random.split(key, 3)

    # Deterministic parameter init: theta = -0.5 * randn(1)  (as in __init__)
    theta = (-0.5 * jax.random.normal(k_theta, (1,))).astype(jnp.float32)

    # Case 1: aligned small shape (multi-row tile, lane-dense).
    B1, N1 = 32, 256
    actions1 = jax.random.bernoulli(k_act1, 0.5, (B1, N1)).astype(jnp.float32)
    out1 = jax.block_until_ready(actor_forward(theta, actions1))
    ref1 = _reference(theta, actions1)
    assert out1.shape == (B1, N1)
    assert jnp.allclose(out1, ref1, atol=1e-6, rtol=1e-6), "mismatch vs reference (aligned)"

    # Case 2: unaligned shape exercising the pad/slice path.
    B2, N2 = 10, 200
    actions2 = jax.random.bernoulli(k_act2, 0.5, (B2, N2)).astype(jnp.float32)
    out2 = jax.block_until_ready(actor_forward(theta, actions2))
    ref2 = _reference(theta, actions2)
    assert out2.shape == (B2, N2)
    assert jnp.allclose(out2, ref2, atol=1e-6, rtol=1e-6), "mismatch vs reference (padded)"

    print("KERNEL_OK")
</pallas_src>

<mosaic_0001>
module attributes {stable_mosaic.version = 11 : i64} {
  func.func @actor_kernel(%arg0: i32, %arg1: memref<1xf32, #tpu.memory_space<smem>>, %arg2: memref<32x256xf32, #tpu.memory_space<vmem>>, %arg3: memref<32x256xf32, #tpu.memory_space<vmem>>) attributes {dimension_semantics = [#tpu.dimension_semantics<parallel>], iteration_bounds = array<i64: 1>, scalar_prefetch = 0 : i64, scratch_operands = 0 : i64, tpu.core_type = #tpu.core_type<tc>, window_params = [{transform_indices = @transform_0, window_bounds = array<i64: 1>}, {transform_indices = @transform_1, window_bounds = array<i64: 32, 256>}, {transform_indices = @transform_2, window_bounds = array<i64: 32, 256>}]} {
    %c0 = arith.constant 0 : index
    %0 = memref.load %arg1[%c0] : memref<1xf32, #tpu.memory_space<smem>>
    %1 = math.absf %0 : f32
    %cst = arith.constant 0.000000e+00 : f32
    %2 = arith.subf %cst, %1 : f32
    %3 = math.exp %2 : f32
    %cst_0 = arith.constant 0.000000e+00 : f32
    %4 = arith.cmpf oge, %0, %cst_0 : f32
    %cst_1 = arith.constant 1.000000e+00 : f32
    %5 = arith.addf %cst_1, %3 : f32
    %6 = arith.divf %3, %5 : f32
    %cst_2 = arith.constant 1.000000e+00 : f32
    %7 = arith.addf %cst_2, %3 : f32
    %cst_3 = arith.constant 1.000000e+00 : f32
    %8 = arith.divf %cst_3, %7 : f32
    %9 = arith.select %4, %6, %8 : f32
    %c0_4 = arith.constant 0 : index
    %c0_5 = arith.constant 0 : index
    %10 = vector.load %arg2[%c0_4, %c0_5] : memref<32x256xf32, #tpu.memory_space<vmem>>, vector<32x256xf32>
    %11 = vector.broadcast %9 : f32 to vector<32x256xf32>
    %12 = arith.subf %11, %10 : vector<32x256xf32>
    %c0_6 = arith.constant 0 : index
    %c0_7 = arith.constant 0 : index
    %13 = vector.load %arg3[%c0_6, %c0_7] : memref<32x256xf32, #tpu.memory_space<vmem>>, vector<32x256xf32>
    tpu.vector_store %arg3[%c0_6, %c0_7], %12 {strides = array<i32>} : memref<32x256xf32, #tpu.memory_space<vmem>>, vector<32x256xf32>,
    return
  }
  func.func @transform_0(%arg0: i32) -> i32 {
    %c0_i32 = arith.constant 0 : i32
    %c0_i32_0 = arith.constant 0 : i32
    return %c0_i32 : i32
  }
  func.func @transform_1(%arg0: i32) -> (i32, i32) {
    %c0_i32 = arith.constant 0 : i32
    %c0_i32_0 = arith.constant 0 : i32
    return %arg0, %c0_i32 : i32, i32
  }
  func.func @transform_2(%arg0: i32) -> (i32, i32) {
    %c0_i32 = arith.constant 0 : i32
    %c0_i32_0 = arith.constant 0 : i32
    return %arg0, %c0_i32 : i32, i32
  }
}

</mosaic_0001>

<bundles_post_ra>
// kernel: tpu_custom_call.1
= control target key start
LH: loop header
LB: loop body
LE: loop exit
PB: predicated region body
PF: predicated region fallthrough
CT: control target
= control target key end

     0   :  { %8 = vsyncpa [#allocation4], 0  ;;  %s217_s0 = inlined_call_operand.<no memory space> [shape: f32[1], index: 0, kind: input, shape index: {}]   ;;  %s218_s1 = inlined_call_operand.hbm [shape: f32[32,256], index: 1, kind: input, shape index: {}]   ;;  %s219_s2 = inlined_call_operand.hbm [shape: f32[32,256], index: 2, kind: output, shape index: {}]  }
   0x1   :  { %9 = vsyncpa [#allocation5], 0  ;;  %s16_s11 = sshll.u32 %s218_s1, 4  ;;  %s180_s12 = smov [#allocation3]   ;;  %s17_s11 = int_to_ptr.hbm [resolvable:$true] %s16_s11 }
   0x2   :  { %s18_s13 = sshll.u32 %s180_s12, 4  ;;  %s181_s14 = smov 256   ;;  %s19_s13 = int_to_ptr.vmem [resolvable:$true] %s18_s13 }
   0x3   :  { %s182_s15 = smov 16   ;;  %s30_s18 = sand.u32 2147483647, %s217_s0 }
   0x4   :  { %24 = dma.hbm_to_vmem [thread:$0]  %s17_s11, 1024, %s19_s13, [#allocation4], %s181_s14, %s181_s14, %s182_s15  }
   0x5   :  { %176 = dma.done.wait [#allocation4], 1024  }
   0x6   :  { %177 = vsyncadd [#allocation4], 4294966272  ;;  %s31_s19 = ssub.f32 0.0, %s30_s18  ;;  %p36_p0 = scmp.ge.f32.partialorder %s217_s0, 0.0  ;;  %v72_v14 = vld [vmem:[#allocation3] sm:$0xff]  ;;  %v73_v15 = vld [vmem:[#allocation3 + $0x8] sm:$0xff] }
   0x7   :  { %v74_v16 = vld [vmem:[#allocation3 + $0x10] sm:$0xff]  ;;  %v75_v17 = vld [vmem:[#allocation3 + $0x18] sm:$0xff]  ;;  %v76_v18 = vld [vmem:[#allocation3 + $0x20] sm:$0xff]  ;;  %s183_s0 = smov [#allocation6]   ;;  %s103_s28 = sshll.u32 %s219_s2, 4  ;;  %s104_s28 = int_to_ptr.hbm [resolvable:$true] %s103_s28 }
   0x8   :  { %v32_v0 = vstv %s31_s19  ;;  %v77_v20 = vld [vmem:[#allocation3 + $0x28] sm:$0xff]  ;;  %v78_v24 = vld [vmem:[#allocation3 + $0x30] sm:$0xff]  ;;  %v79_v26 = vld [vmem:[#allocation3 + $0x38] sm:$0xff]  ;;  %s101_s25 = sshll.u32 %s183_s0, 4  ;;  %s102_s25 = int_to_ptr.vmem [resolvable:$true] %s101_s25 }
   0x9   :  { %v33_v1 = vmul.f32 1.442695, %v32_v0 }
   0xb   :  { %124 = vpow2.f32 %v33_v1 }
  0x11   :  { %v125_v2 = vpop.eup %124 }
  0x12   :  { %116 = vpush %v125_v2 }
  0x43   :  { %s117_s1 = spop %116 }
  0x44   :  { %s37_s20 = sadd.f32 1.0, %s117_s1 }
  0x46   :  { %v38_v3 = vstv %s37_s20 }
  0x47   :  { %126 = vrcp.f32 %v38_v3  ;;  %v50_v7 = vand.u32 2147483648, %v38_v3  ;;  %v48_v9 = vand.u32 2147483647, %v38_v3  ;;  %vm44_vm1 = vweird.f32 %v38_v3 }
  0x49   :  { %v51_v11 = vor.u32 1.1754944e-38, %v50_v7  ;;  %vm49_vm3 = vcmp.eq.f32.partialorder %v48_v9, 8.507059e+37 }
  0x4d   :  { %v127_v4 = vpop.eup %126 }
  0x4e   :  { %v40_v5 = vmul.f32 %v127_v4, %v38_v3  ;;  %vm45_vm0 = vweird.f32 %v127_v4 }
  0x4f   :  { %vm46_vm2 = vmor %vm44_vm1, %vm45_vm0 }
  0x50   :  { %v41_v6 = vsub.f32 1.0, %v40_v5 }
  0x52   :  { %v42_v8 = vmul.f32 %v127_v4, %v41_v6 }
  0x54   :  { %v43_v10 = vadd.f32 %v127_v4, %v42_v8 }
  0x56   :  { %v47_v12 = vsel %vm46_vm2, %v127_v4, %v43_v10 }
  0x57   :  { %v52_v13 = vsel %vm49_vm3, %v51_v11, %v47_v12 }
  0x58   :  { %118 = vpush %v52_v13 }
  0x89   :  { %s119_s23 = spop %118 }
  0x8a   :  { %s54_s24 = smul.f32 %s119_s23, %s117_s1 }
  0x8c   :  { %s221_s24 = smov (!%p36_p0, %s54_s24), %s119_s23 }
  0x8d   :  { %v80_v19 = vstv %s221_s24 }
  0x8e   :  { %v81_v21 = vsub.f32 %v80_v19, %v72_v14  ;;  %v82_v22 = vsub.f32 %v80_v19, %v73_v15  ;;  %v83_v23 = vsub.f32 %v80_v19, %v74_v16  ;;  %v84_v25 = vsub.f32 %v80_v19, %v75_v17 }
  0x8f   :  { %v85_v27 = vsub.f32 %v80_v19, %v76_v18  ;;  %v86_v28 = vsub.f32 %v80_v19, %v77_v20  ;;  %v87_v29 = vsub.f32 %v80_v19, %v78_v24  ;;  %v88_v30 = vsub.f32 %v80_v19, %v79_v26 }
  0x90   :  { %89 = vst [vmem:[#allocation6] sm:$0xff] %v81_v21 }
  0x91   :  { %90 = vst [vmem:[#allocation6 + $0x8] sm:$0xff] %v82_v22 }
  0x92   :  { %91 = vst [vmem:[#allocation6 + $0x10] sm:$0xff] %v83_v23 }
  0x93   :  { %92 = vst [vmem:[#allocation6 + $0x18] sm:$0xff] %v84_v25 }
  0x94   :  { %93 = vst [vmem:[#allocation6 + $0x20] sm:$0xff] %v85_v27 }
  0x95   :  { %94 = vst [vmem:[#allocation6 + $0x28] sm:$0xff] %v86_v28 }
  0x96   :  { %95 = vst [vmem:[#allocation6 + $0x30] sm:$0xff] %v87_v29 }
  0x97   :  { %96 = vst [vmem:[#allocation6 + $0x38] sm:$0xff] %v88_v30 }
  0x98   :  { %109 = dma.vmem_to_hbm [thread:$0]  %s102_s25, 1024, %s104_s28, [#allocation5], %s181_s14, %s181_s14, %s182_s15  }
  0x99   :  { %178 = dma.done.wait [#allocation5], 1024  }
  0x9a   :  { %179 = vsyncadd [#allocation5], 4294966272 }
  0x9b   :  { %114 = vsyncpa [#allocation4], 1 }
  0x9c   :  { %115 = vsyncpa [#allocation5], 1 }

</bundles_post_ra>
